<compile_context>
chip_gen: v5e
topology: v5e:2x2
jax: 0.10.0
libtpu: 0.0.40
codegen_flags: <defaults>
</compile_context>

<pallas_src>
import jax
import jax.numpy as jnp
from jax.experimental import pallas as pl
from jax.experimental.pallas import tpu as pltpu
import numpy as np

LATENT = 32
IN_CH = 4
OUT_CH = 4
OUT_F = OUT_CH * IN_CH            # 16
NEG_SLOPE = 0.2

PAD = 128                         # lane-dense width for activations / weights
ROWS_PER_TILE = 8                 # instances per grid step -> unmasked (8,128) tiles

# ---- merged weight slab layout (width = 128, float32) ----
ROW_W0 = 0                        # rows 0..3  : fused layer-0 weight (4, 128)
ROW_BIAS = 8                      # rows 8..11 : fused biases BB0..BB3 ([b1k | b2k])
ROW_BS1 = 12                      # row 12     : style1 bias (64 lanes)
ROW_BS2 = 13                      # row 13     : style2 bias (16 lanes)
ROW_HID = 16                      # rows 16..  : BD1, BD2, BD3, WS1, WS2 (5 x (128,128))
N_MATS = 5
TOTAL_ROWS = ROW_HID + N_MATS * PAD   # 656 (multiple of 8)


def _lrelu(x):
    return jnp.where(x > 0, x, NEG_SLOPE * x)


def filter_scaling_kernel(metcode_ref, hp_ref, emb_ref, w_ref, out_ref, x_ref):
    base = pl.program_id(0) * ROWS_PER_TILE

    # Hoisted layer-0 weight rows / fused bias (loaded once per tile).
    w_hp = w_ref[ROW_W0 + 0:ROW_W0 + 1, :]
    w_e0 = w_ref[ROW_W0 + 1:ROW_W0 + 2, :]
    w_e1 = w_ref[ROW_W0 + 2:ROW_W0 + 3, :]
    w_e2 = w_ref[ROW_W0 + 3:ROW_W0 + 4, :]
    b0 = w_ref[ROW_BIAS:ROW_BIAS + 1, :]

    # ---- layer 0: per-instance M=1, K=4 -> scalar-broadcast FMAs on the VPU ----
    # Builds the (8,128) activation tile one sublane row per instance.
    for r in range(ROWS_PER_TILE):
        idx = base + r
        # Clamp embedding index into [0, 6] (PyTorch would raise on OOB).
        m = jnp.minimum(jnp.maximum(metcode_ref[idx], 0), 6)
        hp = hp_ref[idx]
        e0 = emb_ref[3 * m + 0]
        e1 = emb_ref[3 * m + 1]
        e2 = emb_ref[3 * m + 2]
        row = hp * w_hp + e0 * w_e0 + e1 * w_e1 + e2 * w_e2 + b0
        x_ref[r:r + 1, :] = _lrelu(row)

    x = x_ref[...]                       # (8, 128); lanes 64..127 are zero

    # ---- 3 block-diag hidden layers + style1: 4 x (8,128)@(128,128) MXU dots ----
    for k in range(4):
        r0 = ROW_HID + k * PAD
        w = w_ref[r0:r0 + PAD, :]
        b = w_ref[ROW_BIAS + 1 + k:ROW_BIAS + 2 + k, :]
        x = _lrelu(jnp.dot(x, w, preferred_element_type=jnp.float32) + b)

    # ---- style2: (8,128)@(128,128) + bias -> unmasked (8,128) store ----
    r0 = ROW_HID + 4 * PAD
    out_ref[...] = (
        jnp.dot(x, w_ref[r0:r0 + PAD, :], preferred_element_type=jnp.float32)
        + w_ref[ROW_BS2:ROW_BS2 + 1, :]
    )


def init_params(key, latent=LATENT, in_ch=IN_CH, out_ch=OUT_CH):
    """Deterministic parameter init (PyTorch-like shapes, weights pre-transposed)."""
    keys = list(jax.random.split(key, 32))
    it = iter(keys)

    def linear(in_f, out_f):
        bound = 1.0 / np.sqrt(in_f)
        w = jax.random.uniform(next(it), (in_f, out_f), jnp.float32, -bound, bound)
        b = jax.random.uniform(next(it), (1, out_f), jnp.float32, -bound, bound)
        return w, b

    emb_tab = jax.random.normal(next(it), (7, 3), jnp.float32)
    params = [emb_tab]
    for in_f in (1, latent, latent, latent):            # mapping1
        params += list(linear(in_f, latent))
    for in_f in (3, latent, latent, latent):            # mapping2
        params += list(linear(in_f, latent))
    params += list(linear(2 * latent, 2 * latent))      # style1
    params += list(linear(2 * latent, out_ch * in_ch))  # style2
    return params


def pack_params(params):
    """Pack the 20 tiny Linear weights/biases into ONE 128-lane-wide VMEM slab.

    Slab (TOTAL_ROWS=656, 128) f32:
      rows 0..3    : fused layer-0 weight  [[w10 | 0], 0; [0 | w20], 0]
      rows 8..11   : fused biases  BB_k = [b1k | b2k | 0]
      row  12      : style1 bias (64 lanes), row 13: style2 bias (16 lanes)
      rows 16..655 : BD1, BD2, BD3 (block-diag 64x64 in a 128x128 tile),
                     WS1 (64x64), WS2 (64x16) — all zero-padded to 128x128.
    Extra lanes/rows are zero, so they contribute nothing to the result.
    Also returns the (7,3) embedding table flattened to (21,) for SMEM.
    """
    (emb_tab, w10, b10, w11, b11, w12, b12, w13, b13,
     w20, b20, w21, b21, w22, b22, w23, b23, ws1, bs1, ws2, bs2) = params
    L = LATENT

    W = jnp.zeros((TOTAL_ROWS, PAD), jnp.float32)
    # layer-0 block-diag weight
    W = W.at[0, 0:L].set(w10[0])
    W = W.at[1:4, L:2 * L].set(w20)
    # fused biases
    for k, (b1, b2) in enumerate(((b10, b20), (b11, b21), (b12, b22), (b13, b23))):
        W = W.at[ROW_BIAS + k, 0:L].set(b1[0])
        W = W.at[ROW_BIAS + k, L:2 * L].set(b2[0])
    W = W.at[ROW_BS1, 0:2 * L].set(bs1[0])
    W = W.at[ROW_BS2, 0:OUT_F].set(bs2[0])
    # hidden block-diag weights
    for k, (wm1, wm2) in enumerate(((w11, w21), (w12, w22), (w13, w23))):
        r = ROW_HID + k * PAD
        W = W.at[r:r + L, 0:L].set(wm1)
        W = W.at[r + L:r + 2 * L, L:2 * L].set(wm2)
    # style1, style2
    r = ROW_HID + 3 * PAD
    W = W.at[r:r + 2 * L, 0:2 * L].set(ws1)
    r = ROW_HID + 4 * PAD
    W = W.at[r:r + 2 * L, 0:OUT_F].set(ws2)

    emb_flat = emb_tab.reshape(-1)       # (21,) -> 1-D SMEM, no (8,128) padding
    return emb_flat, W


def _filter_scaling_batched_impl(hyperparameter, metcode, emb_flat, w_slab):
    """hyperparameter: (N,1) f32, metcode: (N,1) int -> (N, out_ch, in_ch, 1,1,1)."""
    n = hyperparameter.shape[0]
    n_pad = pl.cdiv(n, ROWS_PER_TILE) * ROWS_PER_TILE
    hp = jnp.zeros((n_pad,), jnp.float32).at[:n].set(
        hyperparameter.reshape(n).astype(jnp.float32))
    mc = jnp.zeros((n_pad,), jnp.int32).at[:n].set(
        metcode.reshape(n).astype(jnp.int32))

    grid = (n_pad // ROWS_PER_TILE,)
    out = pl.pallas_call(
        filter_scaling_kernel,
        out_shape=jax.ShapeDtypeStruct((n_pad, PAD), jnp.float32),
        grid_spec=pltpu.PrefetchScalarGridSpec(
            num_scalar_prefetch=0,
            grid=grid,
            in_specs=[
                pl.BlockSpec(memory_space=pltpu.MemorySpace.SMEM),   # metcode (n_pad,) i32
                pl.BlockSpec(memory_space=pltpu.MemorySpace.SMEM),   # hp (n_pad,) f32
                pl.BlockSpec(memory_space=pltpu.MemorySpace.SMEM),   # emb table flat (21,)
                # merged weight slab: constant block index -> DMA'd once, resident
                pl.BlockSpec((TOTAL_ROWS, PAD), lambda i: (0, 0)),
            ],
            out_specs=pl.BlockSpec((ROWS_PER_TILE, PAD), lambda i: (i, 0)),
            scratch_shapes=[pltpu.VMEM((ROWS_PER_TILE, PAD), jnp.float32)],
        ),
        compiler_params=pltpu.CompilerParams(
            dimension_semantics=("parallel",)),      # v7x: split instances across 2 TCs
        cost_estimate=pl.CostEstimate(
            flops=2 * n_pad * PAD * PAD * 5,
            transcendentals=0,
            bytes_accessed=4 * (TOTAL_ROWS * PAD + n_pad * PAD + 2 * n_pad + 21),
        ),
    )(mc, hp, emb_flat, w_slab)
    return out[:n, :OUT_F].reshape(n, OUT_CH, IN_CH, 1, 1, 1)


filter_scaling_batched = jax.jit(_filter_scaling_batched_impl)


def filter_scaling(hyperparameter, metcode, emb_flat, w_slab):
    """Single-instance forward, identical output shape to the PyTorch module."""
    return filter_scaling_batched(hyperparameter, metcode, emb_flat, w_slab)[0]


def reference(hyperparameter, metcode, params):
    """Pure-JAX port of the PyTorch forward (batched)."""
    (emb_tab, w10, b10, w11, b11, w12, b12, w13, b13,
     w20, b20, w21, b21, w22, b22, w23, b23, ws1, bs1, ws2, bs2) = params

    def lrelu(x):
        return jnp.where(x > 0, x, NEG_SLOPE * x)

    emb = emb_tab[metcode[:, 0]]                       # (N,3) == embedding().squeeze(1)
    x1 = hyperparameter.astype(jnp.float32)
    for w, b in ((w10, b10), (w11, b11), (w12, b12), (w13, b13)):
        x1 = lrelu(x1 @ w + b)
    x2 = emb
    for w, b in ((w20, b20), (w21, b21), (w22, b22), (w23, b23)):
        x2 = lrelu(x2 @ w + b)
    cat = jnp.concatenate([x1, x2], axis=1)
    s = lrelu(cat @ ws1 + bs1)
    out = s @ ws2 + bs2
    return out.reshape(-1, OUT_CH, IN_CH, 1, 1, 1)


if __name__ == "__main__":
    key = jax.random.PRNGKey(0)
    k_hp, k_mc, k_params = jax.random.split(key, 3)

    params = init_params(k_params)
    emb_flat, w_slab = pack_params(params)             # one-time host-side packing

    # --- single instance (matches the PyTorch forward exactly) ---
    hp1 = jax.random.uniform(k_hp, (1, 1), jnp.float32)   # tuning knob
    mc1 = jnp.array([[3]], dtype=jnp.int32)                # index into Embedding(7, 3)
    out1 = jax.block_until_ready(filter_scaling(hp1, mc1, emb_flat, w_slab))
    ref1 = reference(hp1, mc1, params)[0]
    assert out1.shape == (OUT_CH, IN_CH, 1, 1, 1), out1.shape
    np.testing.assert_allclose(np.asarray(out1), np.asarray(ref1), rtol=1e-5, atol=1e-5)

    # --- many FilterScaling instances in ONE gridded pallas_call ---
    n = 13                                              # not a multiple of 8 -> exercises padding
    hpn = jax.random.uniform(k_hp, (n, 1), jnp.float32)
    mcn = jax.random.randint(k_mc, (n, 1), 0, 7, dtype=jnp.int32)
    outn = jax.block_until_ready(filter_scaling_batched(hpn, mcn, emb_flat, w_slab))
    refn = reference(hpn, mcn, params)
    assert outn.shape == (n, OUT_CH, IN_CH, 1, 1, 1), outn.shape
    np.testing.assert_allclose(np.asarray(outn), np.asarray(refn), rtol=1e-5, atol=1e-5)

    print("KERNEL_OK")
</pallas_src>

<mosaic_0001>
module attributes {stable_mosaic.version = 11 : i64} {
  func.func @filter_scaling_kernel(%arg0: i32, %arg1: memref<8xi32, #tpu.memory_space<smem>>, %arg2: memref<8xf32, #tpu.memory_space<smem>>, %arg3: memref<21xf32, #tpu.memory_space<smem>>, %arg4: memref<656x128xf32, #tpu.memory_space<vmem>>, %arg5: memref<8x128xf32, #tpu.memory_space<vmem>>, %arg6: memref<8x128xf32, #tpu.memory_space<vmem>>) attributes {dimension_semantics = [#tpu.dimension_semantics<parallel>], iteration_bounds = array<i64: 1>, scalar_prefetch = 0 : i64, scratch_operands = 1 : i64, tpu.core_type = #tpu.core_type<tc>, window_params = [{transform_indices = @transform_0, window_bounds = array<i64: 8>}, {transform_indices = @transform_1, window_bounds = array<i64: 8>}, {transform_indices = @transform_2, window_bounds = array<i64: 21>}, {pipeline_mode = #tpu.pipeline_mode<synchronous>, transform_indices = @transform_3, window_bounds = array<i64: 656, 128>}, {transform_indices = @transform_4, window_bounds = array<i64: 8, 128>}]} {
    %c8_i32 = arith.constant 8 : i32
    %0 = arith.muli %arg0, %c8_i32 : i32
    %c0 = arith.constant 0 : index
    %c0_0 = arith.constant 0 : index
    %1 = vector.load %arg4[%c0, %c0_0] : memref<656x128xf32, #tpu.memory_space<vmem>>, vector<1x128xf32>
    %c1 = arith.constant 1 : index
    %c0_1 = arith.constant 0 : index
    %2 = vector.load %arg4[%c1, %c0_1] : memref<656x128xf32, #tpu.memory_space<vmem>>, vector<1x128xf32>
    %c2 = arith.constant 2 : index
    %c0_2 = arith.constant 0 : index
    %3 = vector.load %arg4[%c2, %c0_2] : memref<656x128xf32, #tpu.memory_space<vmem>>, vector<1x128xf32>
    %c3 = arith.constant 3 : index
    %c0_3 = arith.constant 0 : index
    %4 = vector.load %arg4[%c3, %c0_3] : memref<656x128xf32, #tpu.memory_space<vmem>>, vector<1x128xf32>
    %c8 = arith.constant 8 : index
    %c0_4 = arith.constant 0 : index
    %5 = vector.load %arg4[%c8, %c0_4] : memref<656x128xf32, #tpu.memory_space<vmem>>, vector<1x128xf32>
    %c0_i32 = arith.constant 0 : i32
    %6 = arith.addi %0, %c0_i32 : i32
    %7 = arith.index_cast %6 : i32 to index
    %8 = memref.load %arg1[%7] : memref<8xi32, #tpu.memory_space<smem>>
    %c0_i32_5 = arith.constant 0 : i32
    %9 = arith.maxsi %8, %c0_i32_5 : i32
    %c6_i32 = arith.constant 6 : i32
    %10 = arith.minsi %9, %c6_i32 : i32
    %11 = arith.index_cast %6 : i32 to index
    %12 = memref.load %arg2[%11] : memref<8xf32, #tpu.memory_space<smem>>
    %c3_i32 = arith.constant 3 : i32
    %13 = arith.muli %c3_i32, %10 : i32
    %c0_i32_6 = arith.constant 0 : i32
    %14 = arith.addi %13, %c0_i32_6 : i32
    %15 = arith.index_cast %14 : i32 to index
    %16 = memref.load %arg3[%15] : memref<21xf32, #tpu.memory_space<smem>>
    %c3_i32_7 = arith.constant 3 : i32
    %17 = arith.muli %c3_i32_7, %10 : i32
    %c1_i32 = arith.constant 1 : i32
    %18 = arith.addi %17, %c1_i32 : i32
    %19 = arith.index_cast %18 : i32 to index
    %20 = memref.load %arg3[%19] : memref<21xf32, #tpu.memory_space<smem>>
    %c3_i32_8 = arith.constant 3 : i32
    %21 = arith.muli %c3_i32_8, %10 : i32
    %c2_i32 = arith.constant 2 : i32
    %22 = arith.addi %21, %c2_i32 : i32
    %23 = arith.index_cast %22 : i32 to index
    %24 = memref.load %arg3[%23] : memref<21xf32, #tpu.memory_space<smem>>
    %25 = vector.broadcast %12 : f32 to vector<1x128xf32>
    %26 = arith.mulf %25, %1 : vector<1x128xf32>
    %27 = vector.broadcast %16 : f32 to vector<1x128xf32>
    %28 = arith.mulf %27, %2 : vector<1x128xf32>
    %29 = arith.addf %26, %28 : vector<1x128xf32>
    %30 = vector.broadcast %20 : f32 to vector<1x128xf32>
    %31 = arith.mulf %30, %3 : vector<1x128xf32>
    %32 = arith.addf %29, %31 : vector<1x128xf32>
    %33 = vector.broadcast %24 : f32 to vector<1x128xf32>
    %34 = arith.mulf %33, %4 : vector<1x128xf32>
    %35 = arith.addf %32, %34 : vector<1x128xf32>
    %36 = arith.addf %35, %5 : vector<1x128xf32>
    %cst = arith.constant 0.000000e+00 : f32
    %37 = vector.broadcast %cst : f32 to vector<1x128xf32>
    %38 = arith.cmpf ogt, %36, %37 : vector<1x128xf32>
    %cst_9 = arith.constant 2.000000e-01 : f32
    %39 = vector.broadcast %cst_9 : f32 to vector<1x128xf32>
    %40 = arith.mulf %39, %36 : vector<1x128xf32>
    %41 = arith.select %38, %36, %40 : vector<1x128xi1>, vector<1x128xf32>
    %c0_10 = arith.constant 0 : index
    %c0_11 = arith.constant 0 : index
    %42 = vector.load %arg6[%c0_10, %c0_11] : memref<8x128xf32, #tpu.memory_space<vmem>>, vector<1x128xf32>
    tpu.vector_store %arg6[%c0_10, %c0_11], %41 {strides = array<i32>} : memref<8x128xf32, #tpu.memory_space<vmem>>, vector<1x128xf32>,
    %c1_i32_12 = arith.constant 1 : i32
    %43 = arith.addi %0, %c1_i32_12 : i32
    %44 = arith.index_cast %43 : i32 to index
    %45 = memref.load %arg1[%44] : memref<8xi32, #tpu.memory_space<smem>>
    %c0_i32_13 = arith.constant 0 : i32
    %46 = arith.maxsi %45, %c0_i32_13 : i32
    %c6_i32_14 = arith.constant 6 : i32
    %47 = arith.minsi %46, %c6_i32_14 : i32
    %48 = arith.index_cast %43 : i32 to index
    %49 = memref.load %arg2[%48] : memref<8xf32, #tpu.memory_space<smem>>
    %c3_i32_15 = arith.constant 3 : i32
    %50 = arith.muli %c3_i32_15, %47 : i32
    %c0_i32_16 = arith.constant 0 : i32
    %51 = arith.addi %50, %c0_i32_16 : i32
    %52 = arith.index_cast %51 : i32 to index
    %53 = memref.load %arg3[%52] : memref<21xf32, #tpu.memory_space<smem>>
    %c3_i32_17 = arith.constant 3 : i32
    %54 = arith.muli %c3_i32_17, %47 : i32
    %c1_i32_18 = arith.constant 1 : i32
    %55 = arith.addi %54, %c1_i32_18 : i32
    %56 = arith.index_cast %55 : i32 to index
    %57 = memref.load %arg3[%56] : memref<21xf32, #tpu.memory_space<smem>>
    %c3_i32_19 = arith.constant 3 : i32
    %58 = arith.muli %c3_i32_19, %47 : i32
    %c2_i32_20 = arith.constant 2 : i32
    %59 = arith.addi %58, %c2_i32_20 : i32
    %60 = arith.index_cast %59 : i32 to index
    %61 = memref.load %arg3[%60] : memref<21xf32, #tpu.memory_space<smem>>
    %62 = vector.broadcast %49 : f32 to vector<1x128xf32>
    %63 = arith.mulf %62, %1 : vector<1x128xf32>
    %64 = vector.broadcast %53 : f32 to vector<1x128xf32>
    %65 = arith.mulf %64, %2 : vector<1x128xf32>
    %66 = arith.addf %63, %65 : vector<1x128xf32>
    %67 = vector.broadcast %57 : f32 to vector<1x128xf32>
    %68 = arith.mulf %67, %3 : vector<1x128xf32>
    %69 = arith.addf %66, %68 : vector<1x128xf32>
    %70 = vector.broadcast %61 : f32 to vector<1x128xf32>
    %71 = arith.mulf %70, %4 : vector<1x128xf32>
    %72 = arith.addf %69, %71 : vector<1x128xf32>
    %73 = arith.addf %72, %5 : vector<1x128xf32>
    %cst_21 = arith.constant 0.000000e+00 : f32
    %74 = vector.broadcast %cst_21 : f32 to vector<1x128xf32>
    %75 = arith.cmpf ogt, %73, %74 : vector<1x128xf32>
    %cst_22 = arith.constant 2.000000e-01 : f32
    %76 = vector.broadcast %cst_22 : f32 to vector<1x128xf32>
    %77 = arith.mulf %76, %73 : vector<1x128xf32>
    %78 = arith.select %75, %73, %77 : vector<1x128xi1>, vector<1x128xf32>
    %c1_23 = arith.constant 1 : index
    %c0_24 = arith.constant 0 : index
    %79 = vector.load %arg6[%c1_23, %c0_24] : memref<8x128xf32, #tpu.memory_space<vmem>>, vector<1x128xf32>
    tpu.vector_store %arg6[%c1_23, %c0_24], %78 {strides = array<i32>} : memref<8x128xf32, #tpu.memory_space<vmem>>, vector<1x128xf32>,
    %c2_i32_25 = arith.constant 2 : i32
    %80 = arith.addi %0, %c2_i32_25 : i32
    %81 = arith.index_cast %80 : i32 to index
    %82 = memref.load %arg1[%81] : memref<8xi32, #tpu.memory_space<smem>>
    %c0_i32_26 = arith.constant 0 : i32
    %83 = arith.maxsi %82, %c0_i32_26 : i32
    %c6_i32_27 = arith.constant 6 : i32
    %84 = arith.minsi %83, %c6_i32_27 : i32
    %85 = arith.index_cast %80 : i32 to index
    %86 = memref.load %arg2[%85] : memref<8xf32, #tpu.memory_space<smem>>
    %c3_i32_28 = arith.constant 3 : i32
    %87 = arith.muli %c3_i32_28, %84 : i32
    %c0_i32_29 = arith.constant 0 : i32
    %88 = arith.addi %87, %c0_i32_29 : i32
    %89 = arith.index_cast %88 : i32 to index
    %90 = memref.load %arg3[%89] : memref<21xf32, #tpu.memory_space<smem>>
    %c3_i32_30 = arith.constant 3 : i32
    %91 = arith.muli %c3_i32_30, %84 : i32
    %c1_i32_31 = arith.constant 1 : i32
    %92 = arith.addi %91, %c1_i32_31 : i32
    %93 = arith.index_cast %92 : i32 to index
    %94 = memref.load %arg3[%93] : memref<21xf32, #tpu.memory_space<smem>>
    %c3_i32_32 = arith.constant 3 : i32
    %95 = arith.muli %c3_i32_32, %84 : i32
    %c2_i32_33 = arith.constant 2 : i32
    %96 = arith.addi %95, %c2_i32_33 : i32
    %97 = arith.index_cast %96 : i32 to index
    %98 = memref.load %arg3[%97] : memref<21xf32, #tpu.memory_space<smem>>
    %99 = vector.broadcast %86 : f32 to vector<1x128xf32>
    %100 = arith.mulf %99, %1 : vector<1x128xf32>
    %101 = vector.broadcast %90 : f32 to vector<1x128xf32>
    %102 = arith.mulf %101, %2 : vector<1x128xf32>
    %103 = arith.addf %100, %102 : vector<1x128xf32>
    %104 = vector.broadcast %94 : f32 to vector<1x128xf32>
    %105 = arith.mulf %104, %3 : vector<1x128xf32>
    %106 = arith.addf %103, %105 : vector<1x128xf32>
    %107 = vector.broadcast %98 : f32 to vector<1x128xf32>
    %108 = arith.mulf %107, %4 : vector<1x128xf32>
    %109 = arith.addf %106, %108 : vector<1x128xf32>
    %110 = arith.addf %109, %5 : vector<1x128xf32>
    %cst_34 = arith.constant 0.000000e+00 : f32
    %111 = vector.broadcast %cst_34 : f32 to vector<1x128xf32>
    %112 = arith.cmpf ogt, %110, %111 : vector<1x128xf32>
    %cst_35 = arith.constant 2.000000e-01 : f32
    %113 = vector.broadcast %cst_35 : f32 to vector<1x128xf32>
    %114 = arith.mulf %113, %110 : vector<1x128xf32>
    %115 = arith.select %112, %110, %114 : vector<1x128xi1>, vector<1x128xf32>
    %c2_36 = arith.constant 2 : index
    %c0_37 = arith.constant 0 : index
    %116 = vector.load %arg6[%c2_36, %c0_37] : memref<8x128xf32, #tpu.memory_space<vmem>>, vector<1x128xf32>
    tpu.vector_store %arg6[%c2_36, %c0_37], %115 {strides = array<i32>} : memref<8x128xf32, #tpu.memory_space<vmem>>, vector<1x128xf32>,
    %c3_i32_38 = arith.constant 3 : i32
    %117 = arith.addi %0, %c3_i32_38 : i32
    %118 = arith.index_cast %117 : i32 to index
    %119 = memref.load %arg1[%118] : memref<8xi32, #tpu.memory_space<smem>>
    %c0_i32_39 = arith.constant 0 : i32
    %120 = arith.maxsi %119, %c0_i32_39 : i32
    %c6_i32_40 = arith.constant 6 : i32
    %121 = arith.minsi %120, %c6_i32_40 : i32
    %122 = arith.index_cast %117 : i32 to index
    %123 = memref.load %arg2[%122] : memref<8xf32, #tpu.memory_space<smem>>
    %c3_i32_41 = arith.constant 3 : i32
    %124 = arith.muli %c3_i32_41, %121 : i32
    %c0_i32_42 = arith.constant 0 : i32
    %125 = arith.addi %124, %c0_i32_42 : i32
    %126 = arith.index_cast %125 : i32 to index
    %127 = memref.load %arg3[%126] : memref<21xf32, #tpu.memory_space<smem>>
    %c3_i32_43 = arith.constant 3 : i32
    %128 = arith.muli %c3_i32_43, %121 : i32
    %c1_i32_44 = arith.constant 1 : i32
    %129 = arith.addi %128, %c1_i32_44 : i32
    %130 = arith.index_cast %129 : i32 to index
    %131 = memref.load %arg3[%130] : memref<21xf32, #tpu.memory_space<smem>>
    %c3_i32_45 = arith.constant 3 : i32
    %132 = arith.muli %c3_i32_45, %121 : i32
    %c2_i32_46 = arith.constant 2 : i32
    %133 = arith.addi %132, %c2_i32_46 : i32
    %134 = arith.index_cast %133 : i32 to index
    %135 = memref.load %arg3[%134] : memref<21xf32, #tpu.memory_space<smem>>
    %136 = vector.broadcast %123 : f32 to vector<1x128xf32>
    %137 = arith.mulf %136, %1 : vector<1x128xf32>
    %138 = vector.broadcast %127 : f32 to vector<1x128xf32>
    %139 = arith.mulf %138, %2 : vector<1x128xf32>
    %140 = arith.addf %137, %139 : vector<1x128xf32>
    %141 = vector.broadcast %131 : f32 to vector<1x128xf32>
    %142 = arith.mulf %141, %3 : vector<1x128xf32>
    %143 = arith.addf %140, %142 : vector<1x128xf32>
    %144 = vector.broadcast %135 : f32 to vector<1x128xf32>
    %145 = arith.mulf %144, %4 : vector<1x128xf32>
    %146 = arith.addf %143, %145 : vector<1x128xf32>
    %147 = arith.addf %146, %5 : vector<1x128xf32>
    %cst_47 = arith.constant 0.000000e+00 : f32
    %148 = vector.broadcast %cst_47 : f32 to vector<1x128xf32>
    %149 = arith.cmpf ogt, %147, %148 : vector<1x128xf32>
    %cst_48 = arith.constant 2.000000e-01 : f32
    %150 = vector.broadcast %cst_48 : f32 to vector<1x128xf32>
    %151 = arith.mulf %150, %147 : vector<1x128xf32>
    %152 = arith.select %149, %147, %151 : vector<1x128xi1>, vector<1x128xf32>
    %c3_49 = arith.constant 3 : index
    %c0_50 = arith.constant 0 : index
    %153 = vector.load %arg6[%c3_49, %c0_50] : memref<8x128xf32, #tpu.memory_space<vmem>>, vector<1x128xf32>
    tpu.vector_store %arg6[%c3_49, %c0_50], %152 {strides = array<i32>} : memref<8x128xf32, #tpu.memory_space<vmem>>, vector<1x128xf32>,
    %c4_i32 = arith.constant 4 : i32
    %154 = arith.addi %0, %c4_i32 : i32
    %155 = arith.index_cast %154 : i32 to index
    %156 = memref.load %arg1[%155] : memref<8xi32, #tpu.memory_space<smem>>
    %c0_i32_51 = arith.constant 0 : i32
    %157 = arith.maxsi %156, %c0_i32_51 : i32
    %c6_i32_52 = arith.constant 6 : i32
    %158 = arith.minsi %157, %c6_i32_52 : i32
    %159 = arith.index_cast %154 : i32 to index
    %160 = memref.load %arg2[%159] : memref<8xf32, #tpu.memory_space<smem>>
    %c3_i32_53 = arith.constant 3 : i32
    %161 = arith.muli %c3_i32_53, %158 : i32
    %c0_i32_54 = arith.constant 0 : i32
    %162 = arith.addi %161, %c0_i32_54 : i32
    %163 = arith.index_cast %162 : i32 to index
    %164 = memref.load %arg3[%163] : memref<21xf32, #tpu.memory_space<smem>>
    %c3_i32_55 = arith.constant 3 : i32
    %165 = arith.muli %c3_i32_55, %158 : i32
    %c1_i32_56 = arith.constant 1 : i32
    %166 = arith.addi %165, %c1_i32_56 : i32
    %167 = arith.index_cast %166 : i32 to index
    %168 = memref.load %arg3[%167] : memref<21xf32, #tpu.memory_space<smem>>
    %c3_i32_57 = arith.constant 3 : i32
    %169 = arith.muli %c3_i32_57, %158 : i32
    %c2_i32_58 = arith.constant 2 : i32
    %170 = arith.addi %169, %c2_i32_58 : i32
    %171 = arith.index_cast %170 : i32 to index
    %172 = memref.load %arg3[%171] : memref<21xf32, #tpu.memory_space<smem>>
    %173 = vector.broadcast %160 : f32 to vector<1x128xf32>
    %174 = arith.mulf %173, %1 : vector<1x128xf32>
    %175 = vector.broadcast %164 : f32 to vector<1x128xf32>
    %176 = arith.mulf %175, %2 : vector<1x128xf32>
    %177 = arith.addf %174, %176 : vector<1x128xf32>
    %178 = vector.broadcast %168 : f32 to vector<1x128xf32>
    %179 = arith.mulf %178, %3 : vector<1x128xf32>
    %180 = arith.addf %177, %179 : vector<1x128xf32>
    %181 = vector.broadcast %172 : f32 to vector<1x128xf32>
    %182 = arith.mulf %181, %4 : vector<1x128xf32>
    %183 = arith.addf %180, %182 : vector<1x128xf32>
    %184 = arith.addf %183, %5 : vector<1x128xf32>
    %cst_59 = arith.constant 0.000000e+00 : f32
    %185 = vector.broadcast %cst_59 : f32 to vector<1x128xf32>
    %186 = arith.cmpf ogt, %184, %185 : vector<1x128xf32>
    %cst_60 = arith.constant 2.000000e-01 : f32
    %187 = vector.broadcast %cst_60 : f32 to vector<1x128xf32>
    %188 = arith.mulf %187, %184 : vector<1x128xf32>
    %189 = arith.select %186, %184, %188 : vector<1x128xi1>, vector<1x128xf32>
    %c4 = arith.constant 4 : index
    %c0_61 = arith.constant 0 : index
    %190 = vector.load %arg6[%c4, %c0_61] : memref<8x128xf32, #tpu.memory_space<vmem>>, vector<1x128xf32>
    tpu.vector_store %arg6[%c4, %c0_61], %189 {strides = array<i32>} : memref<8x128xf32, #tpu.memory_space<vmem>>, vector<1x128xf32>,
    %c5_i32 = arith.constant 5 : i32
    %191 = arith.addi %0, %c5_i32 : i32
    %192 = arith.index_cast %191 : i32 to index
    %193 = memref.load %arg1[%192] : memref<8xi32, #tpu.memory_space<smem>>
    %c0_i32_62 = arith.constant 0 : i32
    %194 = arith.maxsi %193, %c0_i32_62 : i32
    %c6_i32_63 = arith.constant 6 : i32
    %195 = arith.minsi %194, %c6_i32_63 : i32
    %196 = arith.index_cast %191 : i32 to index
    %197 = memref.load %arg2[%196] : memref<8xf32, #tpu.memory_space<smem>>
    %c3_i32_64 = arith.constant 3 : i32
    %198 = arith.muli %c3_i32_64, %195 : i32
    %c0_i32_65 = arith.constant 0 : i32
    %199 = arith.addi %198, %c0_i32_65 : i32
    %200 = arith.index_cast %199 : i32 to index
    %201 = memref.load %arg3[%200] : memref<21xf32, #tpu.memory_space<smem>>
    %c3_i32_66 = arith.constant 3 : i32
    %202 = arith.muli %c3_i32_66, %195 : i32
    %c1_i32_67 = arith.constant 1 : i32
    %203 = arith.addi %202, %c1_i32_67 : i32
    %204 = arith.index_cast %203 : i32 to index
    %205 = memref.load %arg3[%204] : memref<21xf32, #tpu.memory_space<smem>>
    %c3_i32_68 = arith.constant 3 : i32
    %206 = arith.muli %c3_i32_68, %195 : i32
    %c2_i32_69 = arith.constant 2 : i32
    %207 = arith.addi %206, %c2_i32_69 : i32
    %208 = arith.index_cast %207 : i32 to index
    %209 = memref.load %arg3[%208] : memref<21xf32, #tpu.memory_space<smem>>
    %210 = vector.broadcast %197 : f32 to vector<1x128xf32>
    %211 = arith.mulf %210, %1 : vector<1x128xf32>
    %212 = vector.broadcast %201 : f32 to vector<1x128xf32>
    %213 = arith.mulf %212, %2 : vector<1x128xf32>
    %214 = arith.addf %211, %213 : vector<1x128xf32>
    %215 = vector.broadcast %205 : f32 to vector<1x128xf32>
    %216 = arith.mulf %215, %3 : vector<1x128xf32>
    %217 = arith.addf %214, %216 : vector<1x128xf32>
    %218 = vector.broadcast %209 : f32 to vector<1x128xf32>
    %219 = arith.mulf %218, %4 : vector<1x128xf32>
    %220 = arith.addf %217, %219 : vector<1x128xf32>
    %221 = arith.addf %220, %5 : vector<1x128xf32>
    %cst_70 = arith.constant 0.000000e+00 : f32
    %222 = vector.broadcast %cst_70 : f32 to vector<1x128xf32>
    %223 = arith.cmpf ogt, %221, %222 : vector<1x128xf32>
    %cst_71 = arith.constant 2.000000e-01 : f32
    %224 = vector.broadcast %cst_71 : f32 to vector<1x128xf32>
    %225 = arith.mulf %224, %221 : vector<1x128xf32>
    %226 = arith.select %223, %221, %225 : vector<1x128xi1>, vector<1x128xf32>
    %c5 = arith.constant 5 : index
    %c0_72 = arith.constant 0 : index
    %227 = vector.load %arg6[%c5, %c0_72] : memref<8x128xf32, #tpu.memory_space<vmem>>, vector<1x128xf32>
    tpu.vector_store %arg6[%c5, %c0_72], %226 {strides = array<i32>} : memref<8x128xf32, #tpu.memory_space<vmem>>, vector<1x128xf32>,
    %c6_i32_73 = arith.constant 6 : i32
    %228 = arith.addi %0, %c6_i32_73 : i32
    %229 = arith.index_cast %228 : i32 to index
    %230 = memref.load %arg1[%229] : memref<8xi32, #tpu.memory_space<smem>>
    %c0_i32_74 = arith.constant 0 : i32
    %231 = arith.maxsi %230, %c0_i32_74 : i32
    %c6_i32_75 = arith.constant 6 : i32
    %232 = arith.minsi %231, %c6_i32_75 : i32
    %233 = arith.index_cast %228 : i32 to index
    %234 = memref.load %arg2[%233] : memref<8xf32, #tpu.memory_space<smem>>
    %c3_i32_76 = arith.constant 3 : i32
    %235 = arith.muli %c3_i32_76, %232 : i32
    %c0_i32_77 = arith.constant 0 : i32
    %236 = arith.addi %235, %c0_i32_77 : i32
    %237 = arith.index_cast %236 : i32 to index
    %238 = memref.load %arg3[%237] : memref<21xf32, #tpu.memory_space<smem>>
    %c3_i32_78 = arith.constant 3 : i32
    %239 = arith.muli %c3_i32_78, %232 : i32
    %c1_i32_79 = arith.constant 1 : i32
    %240 = arith.addi %239, %c1_i32_79 : i32
    %241 = arith.index_cast %240 : i32 to index
    %242 = memref.load %arg3[%241] : memref<21xf32, #tpu.memory_space<smem>>
    %c3_i32_80 = arith.constant 3 : i32
    %243 = arith.muli %c3_i32_80, %232 : i32
    %c2_i32_81 = arith.constant 2 : i32
    %244 = arith.addi %243, %c2_i32_81 : i32
    %245 = arith.index_cast %244 : i32 to index
    %246 = memref.load %arg3[%245] : memref<21xf32, #tpu.memory_space<smem>>
    %247 = vector.broadcast %234 : f32 to vector<1x128xf32>
    %248 = arith.mulf %247, %1 : vector<1x128xf32>
    %249 = vector.broadcast %238 : f32 to vector<1x128xf32>
    %250 = arith.mulf %249, %2 : vector<1x128xf32>
    %251 = arith.addf %248, %250 : vector<1x128xf32>
    %252 = vector.broadcast %242 : f32 to vector<1x128xf32>
    %253 = arith.mulf %252, %3 : vector<1x128xf32>
    %254 = arith.addf %251, %253 : vector<1x128xf32>
    %255 = vector.broadcast %246 : f32 to vector<1x128xf32>
    %256 = arith.mulf %255, %4 : vector<1x128xf32>
    %257 = arith.addf %254, %256 : vector<1x128xf32>
    %258 = arith.addf %257, %5 : vector<1x128xf32>
    %cst_82 = arith.constant 0.000000e+00 : f32
    %259 = vector.broadcast %cst_82 : f32 to vector<1x128xf32>
    %260 = arith.cmpf ogt, %258, %259 : vector<1x128xf32>
    %cst_83 = arith.constant 2.000000e-01 : f32
    %261 = vector.broadcast %cst_83 : f32 to vector<1x128xf32>
    %262 = arith.mulf %261, %258 : vector<1x128xf32>
    %263 = arith.select %260, %258, %262 : vector<1x128xi1>, vector<1x128xf32>
    %c6 = arith.constant 6 : index
    %c0_84 = arith.constant 0 : index
    %264 = vector.load %arg6[%c6, %c0_84] : memref<8x128xf32, #tpu.memory_space<vmem>>, vector<1x128xf32>
    tpu.vector_store %arg6[%c6, %c0_84], %263 {strides = array<i32>} : memref<8x128xf32, #tpu.memory_space<vmem>>, vector<1x128xf32>,
    %c7_i32 = arith.constant 7 : i32
    %265 = arith.addi %0, %c7_i32 : i32
    %266 = arith.index_cast %265 : i32 to index
    %267 = memref.load %arg1[%266] : memref<8xi32, #tpu.memory_space<smem>>
    %c0_i32_85 = arith.constant 0 : i32
    %268 = arith.maxsi %267, %c0_i32_85 : i32
    %c6_i32_86 = arith.constant 6 : i32
    %269 = arith.minsi %268, %c6_i32_86 : i32
    %270 = arith.index_cast %265 : i32 to index
    %271 = memref.load %arg2[%270] : memref<8xf32, #tpu.memory_space<smem>>
    %c3_i32_87 = arith.constant 3 : i32
    %272 = arith.muli %c3_i32_87, %269 : i32
    %c0_i32_88 = arith.constant 0 : i32
    %273 = arith.addi %272, %c0_i32_88 : i32
    %274 = arith.index_cast %273 : i32 to index
    %275 = memref.load %arg3[%274] : memref<21xf32, #tpu.memory_space<smem>>
    %c3_i32_89 = arith.constant 3 : i32
    %276 = arith.muli %c3_i32_89, %269 : i32
    %c1_i32_90 = arith.constant 1 : i32
    %277 = arith.addi %276, %c1_i32_90 : i32
    %278 = arith.index_cast %277 : i32 to index
    %279 = memref.load %arg3[%278] : memref<21xf32, #tpu.memory_space<smem>>
    %c3_i32_91 = arith.constant 3 : i32
    %280 = arith.muli %c3_i32_91, %269 : i32
    %c2_i32_92 = arith.constant 2 : i32
    %281 = arith.addi %280, %c2_i32_92 : i32
    %282 = arith.index_cast %281 : i32 to index
    %283 = memref.load %arg3[%282] : memref<21xf32, #tpu.memory_space<smem>>
    %284 = vector.broadcast %271 : f32 to vector<1x128xf32>
    %285 = arith.mulf %284, %1 : vector<1x128xf32>
    %286 = vector.broadcast %275 : f32 to vector<1x128xf32>
    %287 = arith.mulf %286, %2 : vector<1x128xf32>
    %288 = arith.addf %285, %287 : vector<1x128xf32>
    %289 = vector.broadcast %279 : f32 to vector<1x128xf32>
    %290 = arith.mulf %289, %3 : vector<1x128xf32>
    %291 = arith.addf %288, %290 : vector<1x128xf32>
    %292 = vector.broadcast %283 : f32 to vector<1x128xf32>
    %293 = arith.mulf %292, %4 : vector<1x128xf32>
    %294 = arith.addf %291, %293 : vector<1x128xf32>
    %295 = arith.addf %294, %5 : vector<1x128xf32>
    %cst_93 = arith.constant 0.000000e+00 : f32
    %296 = vector.broadcast %cst_93 : f32 to vector<1x128xf32>
    %297 = arith.cmpf ogt, %295, %296 : vector<1x128xf32>
    %cst_94 = arith.constant 2.000000e-01 : f32
    %298 = vector.broadcast %cst_94 : f32 to vector<1x128xf32>
    %299 = arith.mulf %298, %295 : vector<1x128xf32>
    %300 = arith.select %297, %295, %299 : vector<1x128xi1>, vector<1x128xf32>
    %c7 = arith.constant 7 : index
    %c0_95 = arith.constant 0 : index
    %301 = vector.load %arg6[%c7, %c0_95] : memref<8x128xf32, #tpu.memory_space<vmem>>, vector<1x128xf32>
    tpu.vector_store %arg6[%c7, %c0_95], %300 {strides = array<i32>} : memref<8x128xf32, #tpu.memory_space<vmem>>, vector<1x128xf32>,
    %c0_96 = arith.constant 0 : index
    %c0_97 = arith.constant 0 : index
    %302 = vector.load %arg6[%c0_96, %c0_97] : memref<8x128xf32, #tpu.memory_space<vmem>>, vector<8x128xf32>
    %c16 = arith.constant 16 : index
    %c0_98 = arith.constant 0 : index
    %303 = vector.load %arg4[%c16, %c0_98] : memref<656x128xf32, #tpu.memory_space<vmem>>, vector<128x128xf32>
    %c9 = arith.constant 9 : index
    %c0_99 = arith.constant 0 : index
    %304 = vector.load %arg4[%c9, %c0_99] : memref<656x128xf32, #tpu.memory_space<vmem>>, vector<1x128xf32>
    %cst_100 = arith.constant dense<0.000000e+00> : vector<8x128xf32>
    %305 = tpu.matmul %302, %303, %cst_100 {dimension_numbers = #tpu.dot_dimension_numbers<[1], [0], [0], [1], [0, 0, 1, 1], [], []>} : vector<8x128xf32>, vector<128x128xf32>, vector<8x128xf32> -> vector<8x128xf32>
    %306 = vector.broadcast %304 : vector<1x128xf32> to vector<8x128xf32>
    %307 = arith.addf %305, %306 : vector<8x128xf32>
    %cst_101 = arith.constant 0.000000e+00 : f32
    %308 = vector.broadcast %cst_101 : f32 to vector<8x128xf32>
    %309 = arith.cmpf ogt, %307, %308 : vector<8x128xf32>
    %cst_102 = arith.constant 2.000000e-01 : f32
    %310 = vector.broadcast %cst_102 : f32 to vector<8x128xf32>
    %311 = arith.mulf %310, %307 : vector<8x128xf32>
    %312 = arith.select %309, %307, %311 : vector<8x128xi1>, vector<8x128xf32>
    %c144 = arith.constant 144 : index
    %c0_103 = arith.constant 0 : index
    %313 = vector.load %arg4[%c144, %c0_103] : memref<656x128xf32, #tpu.memory_space<vmem>>, vector<128x128xf32>
    %c10 = arith.constant 10 : index
    %c0_104 = arith.constant 0 : index
    %314 = vector.load %arg4[%c10, %c0_104] : memref<656x128xf32, #tpu.memory_space<vmem>>, vector<1x128xf32>
    %cst_105 = arith.constant dense<0.000000e+00> : vector<8x128xf32>
    %315 = tpu.matmul %312, %313, %cst_105 {dimension_numbers = #tpu.dot_dimension_numbers<[1], [0], [0], [1], [0, 0, 1, 1], [], []>} : vector<8x128xf32>, vector<128x128xf32>, vector<8x128xf32> -> vector<8x128xf32>
    %316 = vector.broadcast %314 : vector<1x128xf32> to vector<8x128xf32>
    %317 = arith.addf %315, %316 : vector<8x128xf32>
    %cst_106 = arith.constant 0.000000e+00 : f32
    %318 = vector.broadcast %cst_106 : f32 to vector<8x128xf32>
    %319 = arith.cmpf ogt, %317, %318 : vector<8x128xf32>
    %cst_107 = arith.constant 2.000000e-01 : f32
    %320 = vector.broadcast %cst_107 : f32 to vector<8x128xf32>
    %321 = arith.mulf %320, %317 : vector<8x128xf32>
    %322 = arith.select %319, %317, %321 : vector<8x128xi1>, vector<8x128xf32>
    %c272 = arith.constant 272 : index
    %c0_108 = arith.constant 0 : index
    %323 = vector.load %arg4[%c272, %c0_108] : memref<656x128xf32, #tpu.memory_space<vmem>>, vector<128x128xf32>
    %c11 = arith.constant 11 : index
    %c0_109 = arith.constant 0 : index
    %324 = vector.load %arg4[%c11, %c0_109] : memref<656x128xf32, #tpu.memory_space<vmem>>, vector<1x128xf32>
    %cst_110 = arith.constant dense<0.000000e+00> : vector<8x128xf32>
    %325 = tpu.matmul %322, %323, %cst_110 {dimension_numbers = #tpu.dot_dimension_numbers<[1], [0], [0], [1], [0, 0, 1, 1], [], []>} : vector<8x128xf32>, vector<128x128xf32>, vector<8x128xf32> -> vector<8x128xf32>
    %326 = vector.broadcast %324 : vector<1x128xf32> to vector<8x128xf32>
    %327 = arith.addf %325, %326 : vector<8x128xf32>
    %cst_111 = arith.constant 0.000000e+00 : f32
    %328 = vector.broadcast %cst_111 : f32 to vector<8x128xf32>
    %329 = arith.cmpf ogt, %327, %328 : vector<8x128xf32>
    %cst_112 = arith.constant 2.000000e-01 : f32
    %330 = vector.broadcast %cst_112 : f32 to vector<8x128xf32>
    %331 = arith.mulf %330, %327 : vector<8x128xf32>
    %332 = arith.select %329, %327, %331 : vector<8x128xi1>, vector<8x128xf32>
    %c400 = arith.constant 400 : index
    %c0_113 = arith.constant 0 : index
    %333 = vector.load %arg4[%c400, %c0_113] : memref<656x128xf32, #tpu.memory_space<vmem>>, vector<128x128xf32>
    %c12 = arith.constant 12 : index
    %c0_114 = arith.constant 0 : index
    %334 = vector.load %arg4[%c12, %c0_114] : memref<656x128xf32, #tpu.memory_space<vmem>>, vector<1x128xf32>
    %cst_115 = arith.constant dense<0.000000e+00> : vector<8x128xf32>
    %335 = tpu.matmul %332, %333, %cst_115 {dimension_numbers = #tpu.dot_dimension_numbers<[1], [0], [0], [1], [0, 0, 1, 1], [], []>} : vector<8x128xf32>, vector<128x128xf32>, vector<8x128xf32> -> vector<8x128xf32>
    %336 = vector.broadcast %334 : vector<1x128xf32> to vector<8x128xf32>
    %337 = arith.addf %335, %336 : vector<8x128xf32>
    %cst_116 = arith.constant 0.000000e+00 : f32
    %338 = vector.broadcast %cst_116 : f32 to vector<8x128xf32>
    %339 = arith.cmpf ogt, %337, %338 : vector<8x128xf32>
    %cst_117 = arith.constant 2.000000e-01 : f32
    %340 = vector.broadcast %cst_117 : f32 to vector<8x128xf32>
    %341 = arith.mulf %340, %337 : vector<8x128xf32>
    %342 = arith.select %339, %337, %341 : vector<8x128xi1>, vector<8x128xf32>
    %c528 = arith.constant 528 : index
    %c0_118 = arith.constant 0 : index
    %343 = vector.load %arg4[%c528, %c0_118] : memref<656x128xf32, #tpu.memory_space<vmem>>, vector<128x128xf32>
    %cst_119 = arith.constant dense<0.000000e+00> : vector<8x128xf32>
    %344 = tpu.matmul %342, %343, %cst_119 {dimension_numbers = #tpu.dot_dimension_numbers<[1], [0], [0], [1], [0, 0, 1, 1], [], []>} : vector<8x128xf32>, vector<128x128xf32>, vector<8x128xf32> -> vector<8x128xf32>
    %c13 = arith.constant 13 : index
    %c0_120 = arith.constant 0 : index
    %345 = vector.load %arg4[%c13, %c0_120] : memref<656x128xf32, #tpu.memory_space<vmem>>, vector<1x128xf32>
    %346 = vector.broadcast %345 : vector<1x128xf32> to vector<8x128xf32>
    %347 = arith.addf %344, %346 : vector<8x128xf32>
    %c0_121 = arith.constant 0 : index
    %c0_122 = arith.constant 0 : index
    %348 = vector.load %arg5[%c0_121, %c0_122] : memref<8x128xf32, #tpu.memory_space<vmem>>, vector<8x128xf32>
    tpu.vector_store %arg5[%c0_121, %c0_122], %347 {strides = array<i32>} : memref<8x128xf32, #tpu.memory_space<vmem>>, vector<8x128xf32>,
    return
  }
  func.func @transform_0(%arg0: i32) -> i32 {
    %c0_i32 = arith.constant 0 : i32
    %c0_i32_0 = arith.constant 0 : i32
    return %c0_i32 : i32
  }
  func.func @transform_1(%arg0: i32) -> i32 {
    %c0_i32 = arith.constant 0 : i32
    %c0_i32_0 = arith.constant 0 : i32
    return %c0_i32 : i32
  }
  func.func @transform_2(%arg0: i32) -> i32 {
    %c0_i32 = arith.constant 0 : i32
    %c0_i32_0 = arith.constant 0 : i32
    return %c0_i32 : i32
  }
  func.func @transform_3(%arg0: i32) -> (i32, i32) {
    %c0_i32 = arith.constant 0 : i32
    %c0_i32_0 = arith.constant 0 : i32
    %c0_i32_1 = arith.constant 0 : i32
    return %c0_i32, %c0_i32_0 : i32, i32
  }
  func.func @transform_4(%arg0: i32) -> (i32, i32) {
    %c0_i32 = arith.constant 0 : i32
    %c0_i32_0 = arith.constant 0 : i32
    return %arg0, %c0_i32 : i32, i32
  }
}

</mosaic_0001>

<bundles_post_ra>
// kernel: _filter_scaling_batched_impl.1
= control target key start
LH: loop header
LB: loop body
LE: loop exit
PB: predicated region body
PF: predicated region fallthrough
CT: control target
= control target key end

     0   :  { %9 = vsyncpa [#allocation5], 0  ;;  %s832_s0 = inlined_call_operand.vmem [shape: s32[8], index: 0, kind: input, shape index: {}]   ;;  %s833_s1 = inlined_call_operand.vmem [shape: f32[8], index: 1, kind: input, shape index: {}]   ;;  %s834_s2 = inlined_call_operand.vmem [shape: f32[21], index: 2, kind: input, shape index: {}]   ;;  %s835_s3 = inlined_call_operand.hbm [shape: f32[656,128], index: 3, kind: input, shape index: {}]   ;;  %s836_s4 = inlined_call_operand.vmem [shape: f32[8,128], index: 4, kind: output, shape index: {}]  }
   0x1   :  { %10 = vsyncpa [#allocation7], 0  ;;  %s26_s17 = sshll.u32 %s833_s1, 4  ;;  %s27_s17 = int_to_ptr.vmem [resolvable:$true] %s26_s17 }
   0x2   :  { %11 = vsyncpa [#allocation4], 0  ;;  %s17_s20 = sshll.u32 %s832_s0, 4  ;;  %s664_s21 = smov [#allocation6]   ;;  %s18_s20 = int_to_ptr.vmem [resolvable:$true] %s17_s20 }
   0x3   :  { %29 = dma.vmem_to_smem %s27_s17, 16, %s664_s21, [#allocation7]  }
   0x4   :  { %s665_s22 = smov [#allocation3]   ;;  %s35_s25 = sshll.u32 %s834_s2, 4  ;;  %s36_s25 = int_to_ptr.vmem [resolvable:$true] %s35_s25 }
   0x5   :  { %20 = dma.vmem_to_smem %s18_s20, 16, %s665_s22, [#allocation5]  }
   0x6   :  { %s43_s1 = sshll.u32 %s835_s3, 4  ;;  %s666_s28 = smov [#allocation8]   ;;  %s44_s1 = int_to_ptr.hbm [resolvable:$true] %s43_s1 }
   0x7   :  { %38 = dma.vmem_to_smem %s36_s25, 16, %s666_s28, [#allocation7]  }
   0x8   :  { %s667_s29 = smov [#allocation9]   ;;  %s668_s0 = smov 128  }
   0x9   :  { %s45_s30 = sshll.u32 %s667_s29, 4  ;;  %s669_s5 = smov 8   ;;  %s46_s30 = int_to_ptr.vmem [resolvable:$true] %s45_s30 }
   0xa   :  { %51 = dma.hbm_to_vmem [thread:$0]  %s44_s1, 10496, %s46_s30, [#allocation4], %s668_s0, %s668_s0, %s669_s5  }
   0xb   :  { %658 = dma.done.wait [#allocation5], 16  }
   0xc   :  { %659 = vsyncadd [#allocation5], 4294967280 }
   0xd   :  { %660 = dma.done.wait [#allocation7], 32  }
   0xe   :  { %661 = vsyncadd [#allocation7], 4294967264 }
   0xf   :  { %662 = dma.done.wait [#allocation4], 10496  }
  0x10   :  { %663 = vsyncadd [#allocation4], 4294956800 }
  0x11   :  { %68 = sfence }
  0x12   :  { %v322_v0 = vld [vmem:[#allocation9 + $0x88] sm:$0xff]  ;;  %v321_v1 = vld [vmem:[#allocation9 + $0x80] sm:$0xff]  ;;  %s75_s2 = sld [smem:[#allocation3]]  ;;  %v320_v2 = vld [vmem:[#allocation9 + $0x78] sm:$0xff] }
  0x13   :  { %325 = vmatpush.msra.mxu0 %v322_v0  ;;  %s522_s3 = sld [smem:[#allocation3 + $0x1]]  ;;  %v319_v3 = vld [vmem:[#allocation9 + $0x70] sm:$0xff]  ;;  %v318_v4 = vld [vmem:[#allocation9 + $0x68] sm:$0xff]  ;;  %v317_v5 = vld [vmem:[#allocation9 + $0x60] sm:$0xff] }
  0x14   :  { %s707_s6 = sld [smem:[#allocation6]]  ;;  %v316_v6 = vld [vmem:[#allocation9 + $0x58] sm:$0xff]  ;;  %v315_v7 = vld [vmem:[#allocation9 + $0x50] sm:$0xff]  ;;  %v314_v8 = vld [vmem:[#allocation9 + $0x48] sm:$0xff] }
  0x15   :  { %326 = vmatpush.msra.mxu0 %v321_v1  ;;  %s709_s7 = sld [smem:[#allocation6 + $0x1]]  ;;  %v313_v9 = vld [vmem:[#allocation9 + $0x40] sm:$0xff]  ;;  %v312_v12 = vld [vmem:[#allocation9 + $0x38] sm:$0xff]  ;;  %v311_v14 = vld [vmem:[#allocation9 + $0x30] sm:$0xff] }
  0x16   :  { %s711_s8 = sld [smem:[#allocation3 + $0x2]]  ;;  %v714_v10 = vld [vmem:[#allocation9] sm:$0x1]  ;;  %v717_v13 = vld [vmem:[#allocation9 + $0x1] sm:$0x1]  ;;  %v310_v20 = vld [vmem:[#allocation9 + $0x28] sm:$0xff] }
  0x17   :  { %327 = vmatpush.msra.mxu0 %v320_v2  ;;  %v722_v15 = vld [vmem:[#allocation9 + $0x2] sm:$0x1]  ;;  %v728_v18 = vld [vmem:[#allocation9 + $0x3] sm:$0x1]  ;;  %s734_s22 = sld [smem:[#allocation6 + $0x2]]  ;;  %v308_v32 = vld [vmem:[#allocation9 + $0x18] sm:$0xff] }
  0x18   :  { %p76_p0 = scmp.gt.s32.totalorder %s75_s2, 0  ;;  %p517_p1 = scmp.lt.s32.totalorder %s75_s2, 6  ;;  %v309_v26 = vld [vmem:[#allocation9 + $0x20] sm:$0xff]  ;;  %v751_v36 = vld [vmem:[#allocation9 + $0x8] sm:$0x1]  ;;  %v307_v39 = vld [vmem:[#allocation9 + $0x10] sm:$0xff] }
  0x19   :  { %328 = vmatpush.msra.mxu0 %v319_v3  ;;  %p105_p2 = scmp.gt.s32.totalorder %s522_s3, 0  ;;  %p523_p3 = scmp.lt.s32.totalorder %s522_s3, 6 }
  0x1a   :  { %s838_s2 = smov (!%p76_p0, %s75_s2), 0  ;;  %v87_v11 = vstv %s707_s6  ;;  %s741_s23 = sld [smem:[#allocation3 + $0x3]] }
  0x1b   :  { %329 = vmatpush.msra.mxu0 %v318_v4  ;;  %s840_s3 = smov (!%p105_p2, %s522_s3), 0  ;;  %s842_s2 = smov (!%p517_p1, %s838_s2), 6  ;;  %v88_v16 = vmul.f32 %v87_v11, %v714_v10  ;;  %v116_v17 = vstv %s709_s7 }
  0x1c   :  { %s844_s3 = smov (!%p523_p3, %s840_s3), 6  ;;  %s81_s9 = smul.u32 3, %s842_s2  ;;  %v117_v25 = vmul.f32 %v116_v17, %v714_v10 }
  0x1d   :  { %330 = vmatpush.msra.mxu0 %v317_v5  ;;  %s110_s10 = smul.u32 3, %s844_s3  ;;  %p134_p4 = scmp.gt.s32.totalorder %s711_s8, 0  ;;  %v145_v42 = vstv %s734_s22 }
  0x1e   :  { %s82_s11 = sld [smem:[#allocation8 + %s81_s9]]  ;;  %s83_s12 = sadd.s32 1, %s81_s9  ;;  %v146_v46 = vmul.f32 %v145_v42, %v714_v10  ;;  %v362_v42 = vld [vmem:[#allocation9 + $0x100] sm:$0xff] }
  0x1f   :  { %331 = vmatpush.msra.mxu0 %v316_v6  ;;  %s84_s13 = sld [smem:[#allocation8 + %s83_s12]]  ;;  %s85_s14 = sadd.s32 2, %s81_s9 }
  0x20   :  { %s86_s15 = sld [smem:[#allocation8 + %s85_s14]]  ;;  %s112_s16 = sadd.s32 1, %s110_s10 }
  0x21   :  { %332 = vmatpush.msra.mxu0 %v315_v7  ;;  %s111_s17 = sld [smem:[#allocation8 + %s110_s10]]  ;;  %s114_s18 = sadd.s32 2, %s110_s10 }
  0x22   :  { %s719_s19 = sld [smem:[#allocation8 + %s112_s16]]  ;;  %p530_p5 = scmp.lt.s32.totalorder %s711_s8, 6 }
  0x23   :  { %333 = vmatpush.msra.mxu0 %v314_v8  ;;  %s725_s20 = sld [smem:[#allocation8 + %s114_s18]]  ;;  %p163_p6 = scmp.gt.s32.totalorder %s741_s23, 0 }
  0x24   :  { %v89_v19 = vstv %s82_s11  ;;  %s135_s21 = scalar_select %p134_p4, %s711_s8, 0 }
  0x25   :  { %334 = vmatpush.msra.mxu0 %v313_v9  ;;  %v90_v21 = vmul.f32 %v89_v19, %v717_v13  ;;  %v92_v22 = vstv %s84_s13  ;;  %s745_s25 = sld [smem:[#allocation6 + $0x3]]  ;;  %p537_p7 = scmp.lt.s32.totalorder %s741_s23, 6 }
  0x26   :  { %v93_v23 = vmul.f32 %v92_v22, %v722_v15  ;;  %v95_v24 = vstv %s86_s15  ;;  %s846_s21 = smov (!%p530_p5, %s135_s21), 6  ;;  %s749_s26 = sld [smem:[#allocation3 + $0x4]] }
  0x27   :  { %335 = vmatpush.msra.mxu0 %v312_v12  ;;  %v91_v27 = vadd.f32 %v90_v21, %v88_v16  ;;  %v96_v28 = vmul.f32 %v95_v24, %v728_v18  ;;  %v118_v29 = vstv %s111_s17  ;;  %s139_s24 = smul.u32 3, %s846_s21  ;;  %s758_s0 = sld [smem:[#allocation6 + $0x4]] }
  0x28   :  { %v119_v30 = vmul.f32 %v118_v29, %v717_v13  ;;  %v121_v31 = vstv %s719_s19  ;;  %s164_s5 = scalar_select %p163_p6, %s741_s23, 0 }
  0x29   :  { %336 = vmatpush.msra.mxu0 %v311_v14  ;;  %v94_v33 = vadd.f32 %v93_v23, %v91_v27  ;;  %v122_v34 = vmul.f32 %v121_v31, %v722_v15  ;;  %v124_v35 = vstv %s725_s20  ;;  %s140_s27 = sld [smem:[#allocation8 + %s139_s24]]  ;;  %s141_s1 = sadd.s32 1, %s139_s24 }
  0x2a   :  { %v120_v37 = vadd.f32 %v119_v30, %v117_v25  ;;  %v125_v38 = vmul.f32 %v124_v35, %v728_v18  ;;  %s142_s28 = sld [smem:[#allocation8 + %s141_s1]]  ;;  %s143_s29 = sadd.s32 2, %s139_s24 }
  0x2b   :  { %337 = vmatpush.msra.mxu0 %v310_v20  ;;  %v97_v40 = vadd.f32 %v96_v28, %v94_v33  ;;  %s144_s30 = sld [smem:[#allocation8 + %s143_s29]]  ;;  %s848_s5 = smov (!%p537_p7, %s164_s5), 6  ;;  %v174_v60 = vstv %s745_s25 }
  0x2c   :  { %v123_v41 = vadd.f32 %v122_v34, %v120_v37  ;;  %p192_p8 = scmp.gt.s32.totalorder %s749_s26, 0  ;;  %p544_p9 = scmp.lt.s32.totalorder %s749_s26, 6  ;;  %v175_v62 = vmul.f32 %v174_v60, %v714_v10 }
  0x2d   :  { %338 = vmatpush.msra.mxu0 %v309_v26  ;;  %v98_v43 = vadd.f32 %v97_v40, %v751_v36  ;;  %s168_s3 = smul.u32 3, %s848_s5  ;;  %s771_s6 = sld [smem:[#allocation3 + $0x5]]  ;;  %v203_v1 = vstv %s758_s0 }
  0x2e   :  { %v126_v44 = vadd.f32 %v125_v38, %v123_v41  ;;  %s193_s2 = scalar_select %p192_p8, %s749_s26, 0  ;;  %v204_v9 = vmul.f32 %v203_v1, %v714_v10  ;;  %v363_v41 = vld [vmem:[#allocation9 + $0x108] sm:$0xff] }
  0x2f   :  { %339 = vmatpush.msra.mxu0 %v308_v32  ;;  %vm99_vm0 = vcmp.gt.f32.partialorder %v98_v43, 0.0  ;;  %v100_v45 = vmul.f32 0.2, %v98_v43  ;;  %v147_v48 = vstv %s140_s27  ;;  %s169_s7 = sld [smem:[#allocation8 + %s168_s3]]  ;;  %s170_s8 = sadd.s32 1, %s168_s3  ;;  %366 = vmatpush.msra.mxu1 %v363_v41 }
  0x30   :  { %v127_v47 = vadd.f32 %v126_v44, %v751_v36  ;;  %v148_v50 = vmul.f32 %v147_v48, %v717_v13  ;;  %v150_v51 = vstv %s142_s28  ;;  %s850_s2 = smov (!%p544_p9, %s193_s2), 6  ;;  %s171_s9 = sld [smem:[#allocation8 + %s170_s8]] }
  0x31   :  { %340 = vmatpush.msra.mxu0 %v307_v39  ;;  %v101_v49 = vsel %vm99_vm0, %v98_v43, %v100_v45  ;;  %v151_v53 = vmul.f32 %v150_v51, %v722_v15  ;;  %v153_v54 = vstv %s144_s30  ;;  %s172_s10 = sadd.s32 2, %s168_s3  ;;  %s197_s12 = smul.u32 3, %s850_s2  ;;  %v361_v45 = vld [vmem:[#allocation9 + $0xf8] sm:$0xff]  ;;  %367 = vmatpush.msra.mxu1 %v362_v42 }
  0x32   :  { %102 = vst [vmem:[#allocation2] sm:$0x1] %v101_v49  ;;  %vm128_vm1 = vcmp.gt.f32.partialorder %v127_v47, 0.0  ;;  %v129_v52 = vmul.f32 0.2, %v127_v47  ;;  %v149_v55 = vadd.f32 %v148_v50, %v146_v46  ;;  %v154_v56 = vmul.f32 %v153_v54, %v728_v18  ;;  %s173_s11 = sld [smem:[#allocation8 + %s172_s10]] }
  0x33   :  { %s776_s13 = sld [smem:[#allocation6 + $0x5]]  ;;  %s199_s15 = sadd.s32 1, %s197_s12  ;;  %368 = vmatpush.msra.mxu1 %v361_v45  ;;  %v391_v45 = vld [vmem:[#allocation9 + $0x120] sm:$0xff] }
  0x34   :  { %v130_v57 = vsel %vm128_vm1, %v127_v47, %v129_v52  ;;  %v152_v58 = vadd.f32 %v151_v53, %v149_v55  ;;  %s198_s14 = sld [smem:[#allocation8 + %s197_s12]]  ;;  %s201_s17 = sadd.s32 2, %s197_s12  ;;  %v360_v47 = vld [vmem:[#allocation9 + $0xf0] sm:$0xff]  ;;  %v359_v52 = vld [vmem:[#allocation9 + $0xe8] sm:$0xff] }
  0x35   :  { %131 = vst [vmem:[#allocation2 + $0x1] sm:$0x1] %v130_v57  ;;  %s200_s16 = sld [smem:[#allocation8 + %s199_s15]]  ;;  %v176_v0 = vstv %s169_s7  ;;  %p221_p10 = scmp.gt.s32.totalorder %s771_s6, 0  ;;  %369 = vmatpush.msra.mxu1 %v360_v47  ;;  %v389_v47 = vld [vmem:[#allocation9 + $0x110] sm:$0xff] }
  0x36   :  { %v155_v59 = vadd.f32 %v154_v56, %v152_v58  ;;  %s202_s18 = sld [smem:[#allocation8 + %s201_s17]]  ;;  %v177_v2 = vmul.f32 %v176_v0, %v717_v13  ;;  %v179_v3 = vstv %s171_s9  ;;  %p551_p11 = scmp.lt.s32.totalorder %s771_s6, 6  ;;  %v358_v58 = vld [vmem:[#allocation9 + $0xe0] sm:$0xff]  ;;  %v357_v0 = vld [vmem:[#allocation9 + $0xd8] sm:$0xff] }
  0x37   :  { %s784_s19 = sld [smem:[#allocation3 + $0x6]]  ;;  %v180_v5 = vmul.f32 %v179_v3, %v722_v15  ;;  %s852_s6 = smov (!%p221_p10, %s771_s6), 0  ;;  %370 = vmatpush.msra.mxu1 %v359_v52  ;;  %v441_v52 = vld [vmem:[#allocation9 + $0x1e8] sm:$0xff] }
  0x38   :  { %v156_v61 = vadd.f32 %v155_v59, %v751_v36  ;;  %v182_v6 = vstv %s173_s11  ;;  %v178_v7 = vadd.f32 %v177_v2, %v175_v62  ;;  %s854_s6 = smov (!%p551_p11, %s852_s6), 6  ;;  %s791_s20 = sld [smem:[#allocation3 + $0x7]] }
  0x39   :  { %v183_v8 = vmul.f32 %v182_v6, %v728_v18  ;;  %s226_s21 = smul.u32 3, %s854_s6  ;;  %s794_s22 = sld [smem:[#allocation6 + $0x6]]  ;;  %v232_v25 = vstv %s776_s13  ;;  %371 = vmatpush.msra.mxu1 %v358_v58  ;;  %v356_v6 = vld [vmem:[#allocation9 + $0xd0] sm:$0xff]  ;;  %v435_v58 = vld [vmem:[#allocation9 + $0x1b8] sm:$0xff] }
  0x3a   :  { %vm157_vm2 = vcmp.gt.f32.partialorder %v156_v61, 0.0  ;;  %v158_v63 = vmul.f32 0.2, %v156_v61  ;;  %v205_v11 = vstv %s198_s14  ;;  %v181_v12 = vadd.f32 %v180_v5, %v178_v7  ;;  %s810_s30 = sld [smem:[#allocation6 + $0x7]] }
  0x3b   :  { %v206_v14 = vmul.f32 %v205_v11, %v717_v13  ;;  %v208_v16 = vstv %s200_s16  ;;  %s227_s23 = sld [smem:[#allocation8 + %s226_s21]]  ;;  %s228_s24 = sadd.s32 1, %s226_s21  ;;  %v233_v30 = vmul.f32 %v232_v25, %v714_v10  ;;  %372 = vmatpush.msra.mxu1 %v357_v0  ;;  %v349_v25 = vld [vmem:[#allocation9 + $0x98] sm:$0xff] }
  0x3c   :  { %v159_v4 = vsel %vm157_vm2, %v156_v61, %v158_v63  ;;  %v209_v17 = vmul.f32 %v208_v16, %v722_v15  ;;  %v211_v19 = vstv %s202_s18  ;;  %v184_v20 = vadd.f32 %v183_v8, %v181_v12  ;;  %s229_s25 = sld [smem:[#allocation8 + %s228_s24]]  ;;  %s230_s26 = sadd.s32 2, %s226_s21 }
  0x3d   :  { %160 = vst [vmem:[#allocation2 + $0x2] sm:$0x1] %v159_v4  ;;  %v207_v21 = vadd.f32 %v206_v14, %v204_v9  ;;  %v212_v22 = vmul.f32 %v211_v19, %v728_v18  ;;  %p250_p12 = scmp.gt.s32.totalorder %s784_s19, 0  ;;  %p558_p13 = scmp.lt.s32.totalorder %s784_s19, 6  ;;  %373 = vmatpush.msra.mxu1 %v356_v6  ;;  %v354_v14 = vld [vmem:[#allocation9 + $0xc0] sm:$0xff] }
  0x3e   :  { %v185_v23 = vadd.f32 %v184_v20, %v751_v36  ;;  %s231_s27 = sld [smem:[#allocation8 + %s230_s26]]  ;;  %p279_p0 = scmp.gt.s32.totalorder %s791_s20, 0  ;;  %v352_v20 = vld [vmem:[#allocation9 + $0xb0] sm:$0xff]  ;;  %v485_v6 = vld [vmem:[#allocation9 + $0x280] sm:$0xff] }
  0x3f   :  { %v210_v24 = vadd.f32 %v209_v17, %v207_v21  ;;  %s251_s1 = scalar_select %p250_p12, %s784_s19, 0  ;;  %v261_v44 = vstv %s794_s22  ;;  %v353_v17 = vld [vmem:[#allocation9 + $0xb8] sm:$0xff]  ;;  %v351_v21 = vld [vmem:[#allocation9 + $0xa8] sm:$0xff] }
  0x40   :  { %vm186_vm3 = vcmp.gt.f32.partialorder %v185_v23, 0.0  ;;  %v187_v26 = vmul.f32 0.2, %v185_v23  ;;  %p565_p1 = scmp.lt.s32.totalorder %s791_s20, 6  ;;  %v262_v48 = vmul.f32 %v261_v44, %v714_v10  ;;  %v290_v51 = vstv %s810_s30 }
  0x41   :  { %v213_v27 = vadd.f32 %v212_v22, %v210_v24  ;;  %s856_s1 = smov (!%p558_p13, %s251_s1), 6  ;;  %v234_v31 = vstv %s227_s23  ;;  %v291_v61 = vmul.f32 %v290_v51, %v714_v10  ;;  %v355_v10 = vld [vmem:[#allocation9 + $0xc8] sm:$0xff]  ;;  %v350_v24 = vld [vmem:[#allocation9 + $0xa0] sm:$0xff]  ;;  %v442_v51 = vld [vmem:[#allocation9 + $0x1f0] sm:$0xff] }
  0x42   :  { %v188_v28 = vsel %vm186_vm3, %v185_v23, %v187_v26  ;;  %s280_s28 = scalar_select %p279_p0, %s791_s20, 0  ;;  %v235_v33 = vmul.f32 %v234_v31, %v717_v13  ;;  %v237_v34 = vstv %s229_s25  ;;  %374 = vmatpush.msra.mxu1 %v355_v10  ;;  %v348_v26 = vld [vmem:[#allocation9 + $0x90] sm:$0xff]  ;;  %v399_v31 = vld [vmem:[#allocation9 + $0x160] sm:$0xff] }
  0x43   :  { %v214_v29 = vadd.f32 %v213_v27, %v751_v36  ;;  %189 = vst [vmem:[#allocation2 + $0x3] sm:$0x1] %v188_v28  ;;  %s255_s29 = smul.u32 3, %s856_s1  ;;  %v238_v35 = vmul.f32 %v237_v34, %v722_v15  ;;  %v403_v27 = vld [vmem:[#allocation9 + $0x180] sm:$0xff]  ;;  %v402_v28 = vld [vmem:[#allocation9 + $0x178] sm:$0xff]  ;;  %v396_v34 = vld [vmem:[#allocation9 + $0x148] sm:$0xff] }
  0x44   :  { %v240_v37 = vstv %s231_s27  ;;  %s858_s28 = smov (!%p565_p1, %s280_s28), 6  ;;  %v236_v39 = vadd.f32 %v235_v33, %v233_v30  ;;  %375 = vmatpush.msra.mxu1 %v354_v14  ;;  %v400_v30 = vld [vmem:[#allocation9 + $0x168] sm:$0xff]  ;;  %v397_v33 = vld [vmem:[#allocation9 + $0x150] sm:$0xff]  ;;  %v481_v10 = vld [vmem:[#allocation9 + $0x260] sm:$0xff] }
  0x45   :  { %vm215_vm4 = vcmp.gt.f32.partialorder %v214_v29, 0.0  ;;  %v216_v32 = vmul.f32 0.2, %v214_v29  ;;  %v241_v40 = vmul.f32 %v240_v37, %v728_v18  ;;  %s256_s0 = sld [smem:[#allocation8 + %s255_s29]]  ;;  %s257_s5 = sadd.s32 1, %s255_s29  ;;  %v394_v37 = vld [vmem:[#allocation9 + $0x138] sm:$0xff] }
  0x46   :  { %s258_s2 = sld [smem:[#allocation8 + %s257_s5]]  ;;  %s259_s3 = sadd.s32 2, %s255_s29  ;;  %v239_v43 = vadd.f32 %v238_v35, %v236_v39  ;;  %376 = vmatpush.msra.mxu1 %v353_v17  ;;  %v395_v35 = vld [vmem:[#allocation9 + $0x140] sm:$0xff]  ;;  %v392_v39 = vld [vmem:[#allocation9 + $0x128] sm:$0xff]  ;;  %v475_v17 = vld [vmem:[#allocation9 + $0x230] sm:$0xff] }
  0x47   :  { %v217_v38 = vsel %vm215_vm4, %v214_v29, %v216_v32  ;;  %s260_s6 = sld [smem:[#allocation8 + %s259_s3]]  ;;  %s284_s7 = smul.u32 3, %s858_s28  ;;  %v401_v29 = vld [vmem:[#allocation9 + $0x170] sm:$0xff]  ;;  %v398_v32 = vld [vmem:[#allocation9 + $0x158] sm:$0xff]  ;;  %v478_v14 = vld [vmem:[#allocation9 + $0x248] sm:$0xff] }
  0x48   :  { %218 = vst [vmem:[#allocation2 + $0x4] sm:$0x1] %v217_v38  ;;  %v242_v46 = vadd.f32 %v241_v40, %v239_v43  ;;  %377 = vmatpush.msra.mxu1 %v352_v20  ;;  %v393_v38 = vld [vmem:[#allocation9 + $0x130] sm:$0xff]  ;;  %v593_v40 = vld [vmem:[#allocation9 + $0x9] ss:$0 sm:$0xff] }
  0x49   :  { %s285_s8 = sld [smem:[#allocation8 + %s284_s7]]  ;;  %s286_s9 = sadd.s32 1, %s284_s7 }
  0x4a   :  { %s287_s10 = sld [smem:[#allocation8 + %s286_s9]]  ;;  %s288_s11 = sadd.s32 2, %s284_s7  ;;  %v243_v49 = vadd.f32 %v242_v46, %v751_v36  ;;  %378 = vmatpush.msra.mxu1 %v351_v21  ;;  %v390_v46 = vld [vmem:[#allocation9 + $0x118] sm:$0xff] }
  0x4b   :  { %v263_v50 = vstv %s256_s0  ;;  %s289_s12 = sld [smem:[#allocation8 + %s288_s11]] }
  0x4c   :  { %v264_v53 = vmul.f32 %v263_v50, %v717_v13  ;;  %v266_v54 = vstv %s258_s2  ;;  %vm244_vm5 = vcmp.gt.f32.partialorder %v243_v49, 0.0  ;;  %v245_v55 = vmul.f32 0.2, %v243_v49  ;;  %379 = vmatpush.msra.mxu1 %v350_v24  ;;  %v443_v50 = vld [vmem:[#allocation9 + $0x1f8] sm:$0xff] }
  0x4d   :  { %v267_v56 = vmul.f32 %v266_v54, %v722_v15  ;;  %v269_v57 = vstv %s260_s6  ;;  %v439_v54 = vld [vmem:[#allocation9 + $0x1d8] sm:$0xff] }
  0x4e   :  { %v265_v59 = vadd.f32 %v264_v53, %v262_v48  ;;  %v270_v60 = vmul.f32 %v269_v57, %v728_v18  ;;  %v246_v62 = vsel %vm244_vm5, %v243_v49, %v245_v55  ;;  %380 = vmatpush.msra.mxu1 %v349_v25  ;;  %v445_v48 = vld [vmem:[#allocation9 + $0x208] sm:$0xff]  ;;  %v444_v49 = vld [vmem:[#allocation9 + $0x200] sm:$0xff]  ;;  %v438_v55 = vld [vmem:[#allocation9 + $0x1d0] sm:$0xff] }
  0x4f   :  { %v292_v63 = vstv %s285_s8  ;;  %247 = vst [vmem:[#allocation2 + $0x5] sm:$0x1] %v246_v62  ;;  %448 = vmatpush.msra.mxu3 %v445_v48  ;;  %v440_v53 = vld [vmem:[#allocation9 + $0x1e0] sm:$0xff]  ;;  %v472_v24 = vld [vmem:[#allocation9 + $0x218] sm:$0xff]  ;;  %v471_v25 = vld [vmem:[#allocation9 + $0x210] sm:$0xff] }
  0x50   :  { %v268_v1 = vadd.f32 %v267_v56, %v265_v59  ;;  %v293_v2 = vmul.f32 %v292_v63, %v717_v13  ;;  %v295_v3 = vstv %s287_s10  ;;  %381 = vmatpush.msra.mxu1 %v348_v26  ;;  %v437_v56 = vld [vmem:[#allocation9 + $0x1c8] sm:$0xff]  ;;  %v436_v57 = vld [vmem:[#allocation9 + $0x1c0] sm:$0xff]  ;;  %v434_v59 = vld [vmem:[#allocation9 + $0x1b0] sm:$0xff] }
  0x51   :  { %v296_v4 = vmul.f32 %v295_v3, %v722_v15  ;;  %v298_v5 = vstv %s289_s12  ;;  %449 = vmatpush.msra.mxu3 %v444_v49  ;;  %v431_v3 = vld [vmem:[#allocation9 + $0x198] sm:$0xff]  ;;  %v596_v26 = vld [vmem:[#allocation9 + $0xc] ss:$0 sm:$0xff] }
  0x52   :  { %v271_v7 = vadd.f32 %v270_v60, %v268_v1  ;;  %v294_v8 = vadd.f32 %v293_v2, %v291_v61  ;;  %v299_v9 = vmul.f32 %v298_v5, %v728_v18  ;;  %v433_v60 = vld [vmem:[#allocation9 + $0x1a8] sm:$0xff]  ;;  %v432_v2 = vld [vmem:[#allocation9 + $0x1a0] sm:$0xff] }
  0x53   :  { %450 = vmatpush.msra.mxu3 %v443_v50  ;;  %v594_v61 = vld [vmem:[#allocation9 + $0xa] ss:$0 sm:$0xff] }
  0x54   :  { %v272_v11 = vadd.f32 %v271_v7, %v751_v36  ;;  %v297_v12 = vadd.f32 %v296_v4, %v294_v8  ;;  %v430_v4 = vld [vmem:[#allocation9 + $0x190] sm:$0xff]  ;;  %v486_v5 = vld [vmem:[#allocation9 + $0x288] sm:$0xff]  ;;  %v484_v7 = vld [vmem:[#allocation9 + $0x278] sm:$0xff] }
  0x55   :  { %451 = vmatpush.msra.mxu3 %v442_v51  ;;  %489 = vmatpush.msrb.mxu0 %v486_v5  ;;  %v483_v8 = vld [vmem:[#allocation9 + $0x270] sm:$0xff] }
  0x56   :  { %vm273_vm6 = vcmp.gt.f32.partialorder %v272_v11, 0.0  ;;  %v274_v16 = vmul.f32 0.2, %v272_v11  ;;  %v300_v13 = vadd.f32 %v299_v9, %v297_v12  ;;  %v482_v9 = vld [vmem:[#allocation9 + $0x268] sm:$0xff]  ;;  %v479_v12 = vld [vmem:[#allocation9 + $0x250] sm:$0xff] }
  0x57   :  { %452 = vmatpush.msra.mxu3 %v441_v52  ;;  %490 = vmatpush.msrb.mxu0 %v485_v6 }
  0x58   :  { %v275_v19 = vsel %vm273_vm6, %v272_v11, %v274_v16  ;;  %v301_v15 = vadd.f32 %v300_v13, %v751_v36  ;;  %v404_v36 = vld [vmem:[#allocation9 + $0x188] sm:$0xff]  ;;  %v480_v11 = vld [vmem:[#allocation9 + $0x258] sm:$0xff]  ;;  %v477_v16 = vld [vmem:[#allocation9 + $0x240] sm:$0xff] }
  0x59   :  { %276 = vst [vmem:[#allocation2 + $0x6] sm:$0x1] %v275_v19  ;;  %407 = vmatpush.msra.mxu2 %v404_v36  ;;  %453 = vmatpush.msra.mxu3 %v440_v53  ;;  %v476_v13 = vld [vmem:[#allocation9 + $0x238] sm:$0xff]  ;;  %v474_v19 = vld [vmem:[#allocation9 + $0x228] sm:$0xff] }
  0x5a   :  { %vm302_vm7 = vcmp.gt.f32.partialorder %v301_v15, 0.0  ;;  %v303_v18 = vmul.f32 0.2, %v301_v15  ;;  %491 = vmatpush.msrb.mxu0 %v484_v7 }
  0x5b   :  { %408 = vmatpush.msra.mxu2 %v403_v27  ;;  %454 = vmatpush.msra.mxu3 %v439_v54 }
  0x5c   :  { %v304_v22 = vsel %vm302_vm7, %v301_v15, %v303_v18  ;;  %492 = vmatpush.msrb.mxu0 %v483_v8  ;;  %v595_v15 = vld [vmem:[#allocation9 + $0xb] ss:$0 sm:$0xff] }
  0x5d   :  { %305 = vst [vmem:[#allocation2 + $0x7] sm:$0x1] %v304_v22  ;;  %409 = vmatpush.msra.mxu2 %v402_v28  ;;  %455 = vmatpush.msra.mxu3 %v438_v55 }
  0x5e   :  { %493 = vmatpush.msrb.mxu0 %v482_v9 }
  0x5f   :  { %410 = vmatpush.msra.mxu2 %v401_v29  ;;  %456 = vmatpush.msra.mxu3 %v437_v56 }
  0x60   :  { %494 = vmatpush.msrb.mxu0 %v481_v10 }
  0x61   :  { %411 = vmatpush.msra.mxu2 %v400_v30  ;;  %457 = vmatpush.msra.mxu3 %v436_v57  ;;  %v597_v30 = vld [vmem:[#allocation9 + $0xd] ss:$0 sm:$0xff] }
  0x62   :  { %495 = vmatpush.msrb.mxu0 %v480_v11 }
  0x63   :  { %412 = vmatpush.msra.mxu2 %v399_v31  ;;  %458 = vmatpush.msra.mxu3 %v435_v58 }
  0x64   :  { %v306_v23 = vld [vmem:[#allocation2] sm:$0xff]  ;;  %496 = vmatpush.msrb.mxu0 %v479_v12 }
  0x65   :  { %341 = vmatmul.f32.vlgmr.msra.gmra.mxu0 %v306_v23  ;;  %413 = vmatpush.msra.mxu2 %v398_v32  ;;  %v473_v23 = vld [vmem:[#allocation9 + $0x220] sm:$0xff] }
  0x66   :  { %459 = vmatpush.msra.mxu3 %v434_v59  ;;  %497 = vmatpush.msrb.mxu0 %v478_v14 }
  0x67   :  { %414 = vmatpush.msra.mxu2 %v397_v33 }
  0x68   :  { %460 = vmatpush.msra.mxu3 %v433_v60  ;;  %498 = vmatpush.msrb.mxu0 %v477_v16 }
  0x69   :  { %415 = vmatpush.msra.mxu2 %v396_v34 }
  0x6a   :  { %461 = vmatpush.msra.mxu3 %v432_v2  ;;  %499 = vmatpush.msrb.mxu0 %v476_v13 }
  0x6b   :  { %416 = vmatpush.msra.mxu2 %v395_v35 }
  0x6c   :  { %462 = vmatpush.msra.mxu3 %v431_v3  ;;  %500 = vmatpush.msrb.mxu0 %v475_v17 }
  0x6d   :  { %417 = vmatpush.msra.mxu2 %v394_v37 }
  0x6e   :  { %463 = vmatpush.msra.mxu3 %v430_v4  ;;  %501 = vmatpush.msrb.mxu0 %v474_v19 }
  0x6f   :  { %418 = vmatpush.msra.mxu2 %v393_v38 }
  0x70   :  { %502 = vmatpush.msrb.mxu0 %v473_v23 }
  0x71   :  { %419 = vmatpush.msra.mxu2 %v392_v39 }
  0x72   :  { %503 = vmatpush.msrb.mxu0 %v472_v24 }
  0x73   :  { %420 = vmatpush.msra.mxu2 %v391_v45 }
  0x74   :  { %504 = vmatpush.msrb.mxu0 %v471_v25 }
  0x75   :  { %421 = vmatpush.msra.mxu2 %v390_v46 }
  0x77   :  { %422 = vmatpush.msra.mxu2 %v389_v47 }
  0xe2   :  { %v342_v41 = vpop.f32.mrf.mxu0 }
  0xe3   :  { %v343_v42 = vadd.f32 %v593_v40, %v342_v41 }
  0xe5   :  { %vm345_vm8 = vcmp.gt.f32.partialorder %v343_v42, 0.0  ;;  %v346_v43 = vmul.f32 0.2, %v343_v42 }
  0xe7   :  { %v347_v44 = vsel %vm345_vm8, %v343_v42, %v346_v43 }
  0xe8   :  { %382 = vmatmul.f32.vlgmr.msra.gmra.mxu1 %v347_v44 }
 0x165   :  { %v383_v62 = vpop.f32.mrf.mxu1 }
 0x166   :  { %v384_v63 = vadd.f32 %v594_v61, %v383_v62 }
 0x168   :  { %vm386_vm9 = vcmp.gt.f32.partialorder %v384_v63, 0.0  ;;  %v387_v0 = vmul.f32 0.2, %v384_v63 }
 0x16a   :  { %v388_v1 = vsel %vm386_vm9, %v384_v63, %v387_v0 }
 0x16b   :  { %423 = vmatmul.f32.vlgmr.msra.gmra.mxu2 %v388_v1 }
 0x1ee   :  { %v424_v20 = vpop.f32.mrf.mxu2 }
 0x1ef   :  { %v425_v18 = vadd.f32 %v595_v15, %v424_v20 }
 0x1f1   :  { %vm427_vm10 = vcmp.gt.f32.partialorder %v425_v18, 0.0  ;;  %v428_v21 = vmul.f32 0.2, %v425_v18 }
 0x1f3   :  { %v429_v22 = vsel %vm427_vm10, %v425_v18, %v428_v21 }
 0x1f4   :  { %464 = vmatmul.f32.vlgmr.msra.gmra.mxu3 %v429_v22 }
 0x277   :  { %v465_v36 = vpop.f32.mrf.mxu3 }
 0x278   :  { %v466_v27 = vadd.f32 %v596_v26, %v465_v36 }
 0x27a   :  { %v469_v28 = vmul.f32 0.2, %v466_v27  ;;  %vm468_vm11 = vcmp.gt.f32.partialorder %v466_v27, 0.0 }
 0x27c   :  { %v470_v29 = vsel %vm468_vm11, %v466_v27, %v469_v28 }
 0x27d   :  { %505 = vmatmul.f32.vlgmr.msrb.gmra.mxu0 %v470_v29 }
 0x2fa   :  { %v506_v31 = vpop.f32.mrf.mxu0 }
 0x2fb   :  { %v507_v32 = vadd.f32 %v597_v30, %v506_v31 }
 0x2fd   :  { %509 = vst [vmem:[%s836_s4] sm:$0xff] %v507_v32 }
 0x2fe   :  { %514 = vsyncpa [#allocation4], 1 }
 0x2ff   :  { %515 = vsyncpa [#allocation5], 1 }
 0x300   :  { %516 = vsyncpa [#allocation7], 1 }

</bundles_post_ra>
